<compile_context>
chip_gen: v7x
topology: tpu7x:2x2x1
jax: 0.10.0
libtpu: 0.0.40
codegen_flags: <defaults>
</compile_context>

<pallas_src>
import jax
import jax.numpy as jnp
from jax import lax
from jax.experimental import pallas as pl
from jax.experimental.pallas import tpu as pltpu

LANE = 128            # minimum lane padding of the feature dim
MAX_LANE_TILE = 512   # lane tile (parallel grid axis)
MAX_SUB = 256         # steps per grid block (sequential "arbitrary" axis)


def hebb_block_kernel(d_ref, t_ref, w0_ref, out_ref, wf_ref):
    # d_ref  : (SUB, LT)  data rows for this block of steps
    # t_ref  : (1, SUB)   per-step targets (lane-dense)
    # w0_ref : (1, LT)    initial weights for this lane tile (read only at step 0)
    # out_ref: (SUB, LT)  per-step outputs  data_k * weights_after_step_k
    # wf_ref : (1, LT)    VMEM-resident weight accumulator (constant step index)

    # Initialise the resident accumulator once per lane tile.  w0_ref is read
    # ONLY here, before any aliased write-back of wf could touch its buffer.
    @pl.when(pl.program_id(1) == 0)
    def _():
        wf_ref[...] = w0_ref[...]

    sub = d_ref.shape[0]
    d = d_ref[...]                         # (SUB, LT)  f32
    t = t_ref[...]                         # (1, SUB)   f32
    w_prev = wf_ref[...]                   # (1, LT)    f32

    # Inclusive lower-triangular prefix matrix with columns scaled by targets:
    #   tri_t[i, j] = t_j  if j <= i  else 0
    row = lax.broadcasted_iota(jnp.int32, (sub, sub), 0)
    col = lax.broadcasted_iota(jnp.int32, (sub, sub), 1)
    tri_t = jnp.where(col <= row, 1.0, 0.0) * t          # (SUB, SUB) f32

    # w_k = w_prev + sum_{j<=k} t_j * d_j   -> one MXU matmul, no serial chain.
    w_delta = jnp.dot(tri_t, d,
                      preferred_element_type=jnp.float32,
                      precision=lax.Precision.HIGHEST)   # (SUB, LT) f32
    w_cum = w_prev + w_delta                             # broadcast over rows

    out_ref[...] = d * w_cum                             # one full-width store
    wf_ref[...] = w_cum[sub - 1:sub, :]                  # carry to next block


def _pad_axis(x, n, axis):
    pad = n - x.shape[axis]
    if pad <= 0:
        return x
    widths = [(0, 0)] * x.ndim
    widths[axis] = (0, pad)
    return jnp.pad(x, widths)


@jax.jit
def hebb_train(data, targets, weights, bias):
    """Run N sequential Hebb_Net.forward steps in ONE pallas_call.

    data:    (N, L) patterns
    targets: (N,)   per-step targets
    weights: (L,)   current weights
    bias:    (1,)   current bias
    Returns (outputs (N, L), new_weights (L,), new_bias (1,)).
    """
    N, L = data.shape

    # Lane tiling (feature dim): pad to 128, tile in 512-lane chunks if wide.
    lp = pl.cdiv(L, LANE) * LANE
    if lp <= MAX_LANE_TILE:
        lane_tile = lp
    else:
        lp = pl.cdiv(lp, MAX_LANE_TILE) * MAX_LANE_TILE
        lane_tile = MAX_LANE_TILE

    # Step tiling: big blocks for real N, shrink for tiny sequences.
    sub = MAX_SUB if N >= MAX_SUB else max(8, int(pl.cdiv(N, 8) * 8))
    n_pad = pl.cdiv(N, sub) * sub
    n_step = n_pad // sub
    n_lane = lp // lane_tile

    # Zero padding is semantically inert: zero data rows / zero targets add
    # nothing to the weight update; padded lanes stay zero.
    d = _pad_axis(_pad_axis(data.astype(jnp.float32), lp, 1), n_pad, 0)
    t = _pad_axis(targets.astype(jnp.float32), n_pad, 0).reshape(n_step, sub)
    w = _pad_axis(weights.astype(jnp.float32).reshape(1, L), lp, 1)

    outs, w_final = pl.pallas_call(
        hebb_block_kernel,
        out_shape=(
            jax.ShapeDtypeStruct((n_pad, lp), jnp.float32),   # per-step outputs
            jax.ShapeDtypeStruct((1, lp), jnp.float32),       # final weights
        ),
        grid=(n_lane, n_step),
        in_specs=[
            pl.BlockSpec((sub, lane_tile), lambda j, i: (i, j)),   # data block
            pl.BlockSpec((1, sub), lambda j, i: (i, 0)),           # targets (lane-dense)
            pl.BlockSpec((1, lane_tile), lambda j, i: (0, j)),     # initial weights
        ],
        out_specs=(
            pl.BlockSpec((sub, lane_tile), lambda j, i: (i, j)),   # outputs
            pl.BlockSpec((1, lane_tile), lambda j, i: (0, j)),     # resident weights
        ),
        input_output_aliases={2: 1},                               # weights in -> out
        compiler_params=pltpu.CompilerParams(
            dimension_semantics=("parallel", "arbitrary"),         # lane ∥, steps seq.
            vmem_limit_bytes=32 * 1024 * 1024),
    )(d, t, w)

    # Scalar bias update stays off the vector path (pure scalar work).
    new_bias = bias.astype(jnp.float32) + jnp.sum(targets.astype(jnp.float32))
    return outs[:N, :L], w_final[0, :L], new_bias


def hebb_forward(data, target, weights, bias):
    """One Hebb_Net.forward step (exact PyTorch semantics)."""
    outs, new_w, new_b = hebb_train(
        data.reshape(1, -1),
        jnp.asarray(target, jnp.float32).reshape(1),
        weights, bias)
    return outs[0], new_w, new_b


if __name__ == "__main__":
    arr_size = (3, 3)
    L = int(arr_size[0] * arr_size[1])
    num_steps = 16

    key = jax.random.PRNGKey(0)
    k1, k2 = jax.random.split(key)
    # Bipolar (+1 / -1) patterns and targets, the typical Hebbian setup.
    data = jnp.where(jax.random.uniform(k1, (num_steps, L)) > 0.5, 1.0, -1.0).astype(jnp.float32)
    targets = jnp.where(jax.random.uniform(k2, (num_steps,)) > 0.5, 1.0, -1.0).astype(jnp.float32)

    # Deterministic parameter init, matching the module __init__ (zeros).
    weights = jnp.zeros((L,), jnp.float32)
    bias = jnp.zeros((1,), jnp.float32)

    # --- single forward step (matches Hebb_Net.forward exactly) ---
    out1, w1, b1 = jax.block_until_ready(hebb_forward(data[0], targets[0], weights, bias))
    ref_w1 = weights + data[0] * targets[0]
    ref_b1 = bias + targets[0]
    ref_out1 = data[0] * ref_w1
    assert jnp.allclose(out1, ref_out1, atol=1e-6), (out1, ref_out1)
    assert jnp.allclose(w1, ref_w1, atol=1e-6), (w1, ref_w1)
    assert jnp.allclose(b1, ref_b1, atol=1e-6), (b1, ref_b1)

    # --- full training sequence folded into one pallas_call ---
    outs, w_fin, b_fin = jax.block_until_ready(hebb_train(data, targets, weights, bias))

    # Pure-JAX sequential reference of the PyTorch training loop.
    rw, rb = weights, bias
    ref_rows = []
    for s in range(num_steps):
        rw = rw + data[s] * targets[s]
        rb = rb + targets[s]
        ref_rows.append(data[s] * rw)
    ref_outs = jnp.stack(ref_rows)

    assert jnp.allclose(outs, ref_outs, atol=1e-5), (outs, ref_outs)
    assert jnp.allclose(w_fin, rw, atol=1e-5), (w_fin, rw)
    assert jnp.allclose(b_fin, rb, atol=1e-5), (b_fin, rb)

    print("KERNEL_OK")
</pallas_src>

<mosaic_0001>
module attributes {stable_mosaic.version = 11 : i64} {
  func.func @hebb_block_kernel(%arg0: i32, %arg1: i32, %arg2: memref<8x128xf32, #tpu.memory_space<vmem>>, %arg3: memref<1x8xf32, #tpu.memory_space<vmem>>, %arg4: memref<1x128xf32, #tpu.memory_space<vmem>>, %arg5: memref<8x128xf32, #tpu.memory_space<vmem>>, %arg6: memref<1x128xf32, #tpu.memory_space<vmem>>) attributes {dimension_semantics = [#tpu.dimension_semantics<parallel>, #tpu.dimension_semantics<arbitrary>], iteration_bounds = array<i64: 1, 1>, scalar_prefetch = 0 : i64, scratch_operands = 0 : i64, tpu.core_type = #tpu.core_type<tc>, window_params = [{transform_indices = @transform_0, window_bounds = array<i64: 8, 128>}, {transform_indices = @transform_1, window_bounds = array<i64: 1, 8>}, {transform_indices = @transform_2, window_bounds = array<i64: 1, 128>}, {transform_indices = @transform_3, window_bounds = array<i64: 8, 128>}, {transform_indices = @transform_4, window_bounds = array<i64: 1, 128>}]} {
    %c0_i32 = arith.constant 0 : i32
    %0 = arith.cmpi eq, %arg1, %c0_i32 : i32
    %1 = arith.extui %0 : i1 to i32
    %c0_i32_0 = arith.constant 0 : i32
    %2 = arith.cmpi ne, %1, %c0_i32_0 : i32
    scf.if %2 {
      %c0_12 = arith.constant 0 : index
      %c0_13 = arith.constant 0 : index
      %21 = vector.load %arg4[%c0_12, %c0_13] : memref<1x128xf32, #tpu.memory_space<vmem>>, vector<1x128xf32>
      %c0_14 = arith.constant 0 : index
      %c0_15 = arith.constant 0 : index
      %22 = vector.load %arg6[%c0_14, %c0_15] : memref<1x128xf32, #tpu.memory_space<vmem>>, vector<1x128xf32>
      tpu.vector_store %arg6[%c0_14, %c0_15], %21 {strides = array<i32>} : memref<1x128xf32, #tpu.memory_space<vmem>>, vector<1x128xf32>,
    } else {
    }
    %c0 = arith.constant 0 : index
    %c0_1 = arith.constant 0 : index
    %3 = vector.load %arg2[%c0, %c0_1] : memref<8x128xf32, #tpu.memory_space<vmem>>, vector<8x128xf32>
    %c0_2 = arith.constant 0 : index
    %c0_3 = arith.constant 0 : index
    %4 = vector.load %arg3[%c0_2, %c0_3] : memref<1x8xf32, #tpu.memory_space<vmem>>, vector<1x8xf32>
    %c0_4 = arith.constant 0 : index
    %c0_5 = arith.constant 0 : index
    %5 = vector.load %arg6[%c0_4, %c0_5] : memref<1x128xf32, #tpu.memory_space<vmem>>, vector<1x128xf32>
    %6 = tpu.iota {dimensions = array<i32: 0>} : vector<8x8xi32>
    %7 = tpu.iota {dimensions = array<i32: 1>} : vector<8x8xi32>
    %8 = arith.cmpi sle, %7, %6 : vector<8x8xi32>
    %cst = arith.constant 1.000000e+00 : f32
    %cst_6 = arith.constant 0.000000e+00 : f32
    %9 = vector.broadcast %cst : f32 to vector<8x8xf32>
    %10 = vector.broadcast %cst_6 : f32 to vector<8x8xf32>
    %11 = arith.select %8, %9, %10 : vector<8x8xi1>, vector<8x8xf32>
    %12 = vector.broadcast %4 : vector<1x8xf32> to vector<8x8xf32>
    %13 = arith.mulf %11, %12 : vector<8x8xf32>
    %cst_7 = arith.constant dense<0.000000e+00> : vector<8x128xf32>
    %14 = tpu.matmul %13, %3, %cst_7 {dimension_numbers = #tpu.dot_dimension_numbers<[1], [0], [0], [1], [0, 0, 1, 1], [], []>, precision = #tpu.contract_precision<fp32>} : vector<8x8xf32>, vector<8x128xf32>, vector<8x128xf32> -> vector<8x128xf32>
    %15 = vector.broadcast %5 : vector<1x128xf32> to vector<8x128xf32>
    %16 = arith.addf %15, %14 : vector<8x128xf32>
    %17 = arith.mulf %3, %16 : vector<8x128xf32>
    %c0_8 = arith.constant 0 : index
    %c0_9 = arith.constant 0 : index
    %18 = vector.load %arg5[%c0_8, %c0_9] : memref<8x128xf32, #tpu.memory_space<vmem>>, vector<8x128xf32>
    tpu.vector_store %arg5[%c0_8, %c0_9], %17 {strides = array<i32>} : memref<8x128xf32, #tpu.memory_space<vmem>>, vector<8x128xf32>,
    %19 = vector.extract_strided_slice %16 {offsets = [7, 0], sizes = [1, 128], strides = [1, 1]} : vector<8x128xf32> to vector<1x128xf32>
    %c0_10 = arith.constant 0 : index
    %c0_11 = arith.constant 0 : index
    %20 = vector.load %arg6[%c0_10, %c0_11] : memref<1x128xf32, #tpu.memory_space<vmem>>, vector<1x128xf32>
    tpu.vector_store %arg6[%c0_10, %c0_11], %19 {strides = array<i32>} : memref<1x128xf32, #tpu.memory_space<vmem>>, vector<1x128xf32>,
    return
  }
  func.func @transform_0(%arg0: i32, %arg1: i32) -> (i32, i32) {
    %c0_i32 = arith.constant 0 : i32
    return %arg1, %arg0 : i32, i32
  }
  func.func @transform_1(%arg0: i32, %arg1: i32) -> (i32, i32) {
    %c0_i32 = arith.constant 0 : i32
    %c0_i32_0 = arith.constant 0 : i32
    return %arg1, %c0_i32 : i32, i32
  }
  func.func @transform_2(%arg0: i32, %arg1: i32) -> (i32, i32) {
    %c0_i32 = arith.constant 0 : i32
    %c0_i32_0 = arith.constant 0 : i32
    return %c0_i32, %arg0 : i32, i32
  }
  func.func @transform_3(%arg0: i32, %arg1: i32) -> (i32, i32) {
    %c0_i32 = arith.constant 0 : i32
    return %arg1, %arg0 : i32, i32
  }
  func.func @transform_4(%arg0: i32, %arg1: i32) -> (i32, i32) {
    %c0_i32 = arith.constant 0 : i32
    %c0_i32_0 = arith.constant 0 : i32
    return %c0_i32, %arg0 : i32, i32
  }
}

</mosaic_0001>

<bundles_post_ra>
// kernel: hebb_train.1
= control target key start
LH: loop header
LB: loop body
LE: loop exit
PB: predicated region body
PF: predicated region fallthrough
CT: control target
= control target key end

     0   :  { %v25_v0 = vlaneseq  ;;  %v552_v1 = vmov 0.0   ;;  %vm553_vm0 = vmmov 0   ;;  %vm38_vm2 = vcmask 64512   ;;  %s611_s0 = inlined_call_operand.vmem [shape: f32[8,128], index: 0, kind: input, shape index: {}]   ;;  %s612_s1 = inlined_call_operand.vmem [shape: f32[1,8], index: 1, kind: input, shape index: {}]   ;;  %s613_s2 = inlined_call_operand.vmem [shape: f32[1,128], index: 2, kind: input, shape index: {}, may-alias: {2,4}]   ;;  %s614_s4 = inlined_call_operand.vmem [shape: f32[1,128], index: 4, kind: output, shape index: {1}, may-alias: {2,4}]   ;;  %s615_s3 = inlined_call_operand.vmem [shape: f32[8,128], index: 3, kind: output, shape index: {0}]  }
   0x1   :  { %520 = vmatprep.subr.mxu0 %v552_v1  ;;  %v582_v2 = vld [vmem:[%s611_s0] sm:$0xff]  ;;  %525 = vmatprep.subr.mxu1 %v552_v1 }
   0x2   :  { %v43_v3 = vand.u32 4294901760, %v582_v2  ;;  %522 = vmatprep.mubr.msk.f32.mxu0 %vm553_vm0, %v552_v1  ;;  %527 = vmatprep.mubr.msk.f32.mxu1 %vm553_vm0, %v552_v1  ;;  %v26_v4 = vshrl.u32 %v25_v0, 7  ;;  %v28_v5 = vand.u32 127, %v25_v0  ;;  %v506_v6 = vld [vmem:[%s612_s1] ss:$0 sm:$0xff] }
   0x3   :  { %v20_v19 = vld [vmem:[%s613_s2] sm:$0x1] }
   0x4   :  { %521 = vmatpush3.msra.mxu0 %v43_v3  ;;  %v120_v7 = vsub.f32 %v582_v2, %v43_v3  ;;  %vm29_vm1 = vcmp.le.s32.totalorder %v28_v5, %v26_v4  ;;  %21 = vst [vmem:[%s614_s4] sm:$0x1] %v20_v19 }
   0x5   :  { %530 = vmatprep.subr.mxu0 %v552_v1  ;;  %v30_v8 = vsel %vm29_vm1, 1.0, %v552_v1 }
   0x6   :  { %v121_v9 = vand.u32 4294901760, %v120_v7  ;;  %v37_v10 = vmul.f32 %v506_v6, %v30_v8 }
   0x8   :  { %v122_v11 = vsub.f32 %v120_v7, %v121_v9  ;;  %v40_v12 = vsel %vm38_vm2, %v37_v10, 0 }
   0x9   :  { %v108_v13 = vand.u32 4294901760, %v40_v12 }
   0xa   :  { %v123_v14 = vand.u32 4294901760, %v122_v11 }
   0xb   :  { %v109_v15 = vsub.f32 %v40_v12, %v108_v13  ;;  %v507_v36 = vld [vmem:[%s614_s4] ss:$0 sm:$0xff] }
   0xc   :  { %526 = vmatpush3.msra.mxu1 %v123_v14 }
   0xd   :  { %v110_v16 = vand.u32 4294901760, %v109_v15  ;;  %528 = vmatmul.mubr.f32.vlgmr.msra.gmra.mrb[0].mxu1 %v108_v13  ;;  %535 = vmatprep.subr.mxu1 %v552_v1 }
   0xe   :  { %536 = vmatpush3.msra.mxu1 %v43_v3  ;;  %537 = vmatprep.mubr.msk.f32.mxu1 %vm553_vm0, %v552_v1 }
   0xf   :  { %v111_v17 = vsub.f32 %v109_v15, %v110_v16  ;;  %545 = vmatprep.subr.mxu1 %v552_v1 }
  0x11   :  { %v112_v18 = vand.u32 4294901760, %v111_v17  ;;  %538 = vmatmul.mubr.f32.vlgmr.msra.gmra.mrb[2].mxu1 %v110_v16 }
  0x12   :  { %546 = vmatpush3.msra.mxu1 %v43_v3  ;;  %547 = vmatprep.mubr.msk.f32.mxu1 %vm553_vm0, %v552_v1 }
  0x13   :  { %523 = vmatmul.mubr.f32.vlgmr.msra.gmra.mrb[0].mxu0 %v112_v18 }
  0x14   :  { %531 = vmatpush3.msra.mxu0 %v120_v7  ;;  %532 = vmatprep.mubr.msk.f32.mxu0 %vm553_vm0, %v552_v1 }
  0x15   :  { %540 = vmatprep.subr.mxu0 %v552_v1  ;;  %548 = vmatmul.mubr.f32.vlgmr.msra.gmra.mrb[4].mxu1 %v108_v13 }
  0x17   :  { %533 = vmatmul.mubr.f32.vlgmr.msra.gmra.mrb[2].mxu0 %v109_v15 }
  0x18   :  { %541 = vmatpush3.msra.mxu0 %v121_v9  ;;  %542 = vmatprep.mubr.msk.f32.mxu0 %vm553_vm0, %v552_v1 }
  0x1b   :  { %543 = vmatmul.mubr.f32.vlgmr.msra.gmra.mrb[4].mxu0 %v108_v13 }
  0xe0   :  { %v190_v20 = vpop.f32.mrb[0].mxu1 }
  0xe1   :  { %v529_v21 = vpop.f32.mrb[1].mxu1 }
  0xe4   :  { %v338_v22 = vpop.f32.mrb[2].mxu1 }
  0xe5   :  { %v539_v23 = vpop.f32.mrb[3].mxu1 }
  0xe6   :  { %v114_v24 = vpop.f32.mrb[0].mxu0 }
  0xe7   :  { %v191_v25 = vadd.f32 %v190_v20, %v114_v24  ;;  %v524_v26 = vpop.f32.mrb[1].mxu0 }
  0xe8   :  { %v484_v27 = vpop.f32.mrb[4].mxu1 }
  0xe9   :  { %v549_v28 = vpop.f32.mrb[5].mxu1 }
  0xea   :  { %v264_v29 = vpop.f32.mrb[2].mxu0 }
  0xeb   :  { %v265_v30 = vadd.f32 %v264_v29, %v191_v25  ;;  %v534_v31 = vpop.f32.mrb[3].mxu0 }
  0xed   :  { %v339_v32 = vadd.f32 %v338_v22, %v265_v30 }
  0xee   :  { %v412_v33 = vpop.f32.mrb[4].mxu0 }
  0xef   :  { %v413_v34 = vadd.f32 %v412_v33, %v339_v32  ;;  %v544_v35 = vpop.f32.mrb[5].mxu0 }
  0xf1   :  { %v485_v37 = vadd.f32 %v484_v27, %v413_v34 }
  0xf3   :  { %v494_v38 = vadd.f32 %v507_v36, %v485_v37 }
  0xf5   :  { %v495_v39 = vmul.f32 %v494_v38, %v582_v2  ;;  %497 = vst [vmem:[%s614_s4 - $0x7] sm:$0x80] %v494_v38 }
  0xf7   :  { %496 = vst [vmem:[%s615_s3] sm:$0xff] %v495_v39 }

</bundles_post_ra>
